<compile_context>
chip_gen: v6e
topology: v6e:2x2x1
jax: 0.10.0
libtpu: 0.0.40
codegen_flags: <defaults>
</compile_context>

<pallas_src>
import jax
import jax.numpy as jnp
from jax import lax
from jax.experimental import pallas as pl
from jax.experimental.pallas import tpu as pltpu

EPS = 1e-5


# --------------------------- kernel building blocks -------------------------
def _conv3_bf16(h, w_ref):
    """k=3, pad=1 conv of h (C_in, L) f32 against w_ref (3, C_out, C_in) bf16.

    Three accumulated MXU dots (bf16 operands, f32 accumulation).  Shifted taps
    are built with pltpu.roll (XLU slot) + static boundary masks of shape
    (1, L) broadcast over channels.
    """
    _, L = h.shape
    lpos = lax.broadcasted_iota(jnp.int32, (1, L), 1)
    # tap k=0 -> h[l-1], k=1 -> h[l], k=2 -> h[l+1]; shifts are non-negative
    # (roll by L-1 == roll by -1).
    h_lm1 = jnp.where(lpos != 0, pltpu.roll(h, shift=1, axis=1), 0.0)
    h_lp1 = jnp.where(lpos != L - 1, pltpu.roll(h, shift=L - 1, axis=1), 0.0)
    acc = jnp.dot(w_ref[0], h_lm1.astype(jnp.bfloat16),
                  preferred_element_type=jnp.float32)
    acc += jnp.dot(w_ref[1], h.astype(jnp.bfloat16),
                   preferred_element_type=jnp.float32)
    acc += jnp.dot(w_ref[2], h_lp1.astype(jnp.bfloat16),
                   preferred_element_type=jnp.float32)
    return acc


def _write_stats(h, sum_ref, ssq_ref):
    # TODO(synk): if the XLU lane reductions ever bind, offload these to the
    # MXU as [h; h*h] @ ones((L, 1)) instead of two full-width jnp.sum calls.
    sum_ref[0] = jnp.sum(h, axis=1, keepdims=True)
    ssq_ref[0] = jnp.sum(h * h, axis=1, keepdims=True)


# --------------------------------- kernels -----------------------------------
def conv_stats_kernel(x_ref, w_ref, h_ref, sum_ref, ssq_ref):
    # pass 1: conv1 + per-batch partial BN1 statistics.
    h = _conv3_bf16(x_ref[0], w_ref)
    h_ref[0] = h
    _write_stats(h, sum_ref, ssq_ref)


def bn_relu_conv_stats_kernel(h1_ref, sc_ref, sh_ref, w_ref,
                              h2_ref, sum_ref, ssq_ref):
    # pass 2: apply BN1 scale/shift + ReLU, conv2, per-batch partial BN2 stats.
    y = jnp.maximum(h1_ref[0] * sc_ref[...] + sh_ref[...], 0.0)
    h2 = _conv3_bf16(y, w_ref)
    h2_ref[0] = h2
    _write_stats(h2, sum_ref, ssq_ref)


def bn_residual_relu_kernel(h2_ref, x_ref, sc_ref, sh_ref, o_ref):
    # pass 3: apply BN2 scale/shift, add identity, ReLU.
    o_ref[0] = jnp.maximum(h2_ref[0] * sc_ref[...] + sh_ref[...] + x_ref[0], 0.0)


# --------------------------------- wrapper -----------------------------------
def _bn_scale_shift(psum, pssq, gamma, beta, count):
    # Fold per-batch partial (sum, sum-sq) into per-channel scale/shift.
    # Tiny (C, 1) math; variance clamped at 0 against f32 cancellation.
    mean = jnp.sum(psum, axis=0) / count          # (C, 1)
    ex2 = jnp.sum(pssq, axis=0) / count           # (C, 1)
    var = jnp.maximum(ex2 - mean * mean, 0.0)
    scale = gamma * lax.rsqrt(var + EPS)
    shift = beta - mean * scale
    return scale, shift


def residual_block(x, params):
    # x: (N, C, L) float32 — layout preserved end-to-end (no wrapper transposes).
    (w1, b1, g1, be1, w2, b2, g2, be2) = params
    del b1, b2   # cancelled exactly by training-mode BN mean subtraction
    N, C, L = x.shape

    # MXU operands in bf16; cast the weights once here.
    w1b = w1.astype(jnp.bfloat16)
    w2b = w2.astype(jnp.bfloat16)

    cparams = pltpu.CompilerParams(
        dimension_semantics=("parallel",),        # batch blocks -> both v7x TCs
        vmem_limit_bytes=32 * 1024 * 1024)        # explicit; fits v7x's 64 MiB

    blk_spec = pl.BlockSpec((1, C, L), lambda n: (n, 0, 0))
    w_spec = pl.BlockSpec((3, C, C), lambda n: (0, 0, 0))
    vec_spec = pl.BlockSpec((C, 1), lambda n: (0, 0))
    stat_spec = pl.BlockSpec((1, C, 1), lambda n: (n, 0, 0))
    act_shape = jax.ShapeDtypeStruct((N, C, L), jnp.float32)
    stat_shape = jax.ShapeDtypeStruct((N, C, 1), jnp.float32)

    # TODO(synk): for L too large for one (1, C, L) block, add an L-tile grid
    # axis ("arbitrary") with halo columns and keep intermediates in bf16 to
    # halve the h1/h2 HBM round-trip traffic.

    # pass 1: conv1 + partial BN1 stats
    h1, s1, ss1 = pl.pallas_call(
        conv_stats_kernel,
        grid=(N,),
        in_specs=[blk_spec, w_spec],
        out_specs=(blk_spec, stat_spec, stat_spec),
        out_shape=(act_shape, stat_shape, stat_shape),
        compiler_params=cparams,
    )(x, w1b)
    scale1, shift1 = _bn_scale_shift(s1, ss1, g1, be1, N * L)

    # pass 2: bn1-apply + relu + conv2 + partial BN2 stats
    h2, s2, ss2 = pl.pallas_call(
        bn_relu_conv_stats_kernel,
        grid=(N,),
        in_specs=[blk_spec, vec_spec, vec_spec, w_spec],
        out_specs=(blk_spec, stat_spec, stat_spec),
        out_shape=(act_shape, stat_shape, stat_shape),
        compiler_params=cparams,
    )(h1, scale1, shift1, w2b)
    scale2, shift2 = _bn_scale_shift(s2, ss2, g2, be2, N * L)

    # pass 3: bn2-apply + residual + relu
    out = pl.pallas_call(
        bn_residual_relu_kernel,
        grid=(N,),
        in_specs=[blk_spec, blk_spec, vec_spec, vec_spec],
        out_specs=blk_spec,
        out_shape=act_shape,
        compiler_params=cparams,
    )(h2, x, scale2, shift2)
    return out


# ---------------- pure-JAX reference (for correctness check) ----------------
def _conv1d_ref(x, w_taps, b):
    # Mirrors the kernel's MXU precision: bf16 operands, f32 accumulation.
    xc = x.astype(jnp.bfloat16).astype(jnp.float32)
    wc = w_taps.astype(jnp.bfloat16).astype(jnp.float32)
    w = jnp.transpose(wc, (1, 2, 0))               # (Cout, Cin, K)
    y = lax.conv_general_dilated(
        xc, w, window_strides=(1,), padding=((1, 1),),
        dimension_numbers=("NCH", "OIH", "NCH"))
    return y + b[None, :, :]


def _bn_ref(y, gamma, beta):
    mean = jnp.mean(y, axis=(0, 2), keepdims=True)
    var = jnp.mean((y - mean) ** 2, axis=(0, 2), keepdims=True)
    return (y - mean) / jnp.sqrt(var + EPS) * gamma[None, :, :] + beta[None, :, :]


def residual_block_ref(x, params):
    (w1, b1, g1, be1, w2, b2, g2, be2) = params
    out = jnp.maximum(_bn_ref(_conv1d_ref(x, w1, b1), g1, be1), 0.0)
    out = _bn_ref(_conv1d_ref(out, w2, b2), g2, be2) + x
    return jnp.maximum(out, 0.0)


def init_params(key, hidden_dim):
    # Conv1d default init: uniform(-bound, bound), bound = 1/sqrt(Cin * K)
    k = 3
    bound = 1.0 / jnp.sqrt(hidden_dim * k)
    ks = jax.random.split(key, 4)
    w1 = jax.random.uniform(ks[0], (k, hidden_dim, hidden_dim),
                            jnp.float32, -bound, bound)
    b1 = jax.random.uniform(ks[1], (hidden_dim, 1), jnp.float32, -bound, bound)
    w2 = jax.random.uniform(ks[2], (k, hidden_dim, hidden_dim),
                            jnp.float32, -bound, bound)
    b2 = jax.random.uniform(ks[3], (hidden_dim, 1), jnp.float32, -bound, bound)
    # BatchNorm default init: gamma=1, beta=0
    g1 = jnp.ones((hidden_dim, 1), jnp.float32)
    be1 = jnp.zeros((hidden_dim, 1), jnp.float32)
    g2 = jnp.ones((hidden_dim, 1), jnp.float32)
    be2 = jnp.zeros((hidden_dim, 1), jnp.float32)
    return (w1, b1, g1, be1, w2, b2, g2, be2)


if __name__ == "__main__":
    N, C, L = 2, 64, 128  # batch, hidden_dim=64 (module spec), sequence length
    key = jax.random.PRNGKey(0)
    kx, kp = jax.random.split(key)
    x = jax.random.normal(kx, (N, C, L), jnp.float32)
    params = init_params(kp, C)

    out = jax.block_until_ready(residual_block(x, params))

    ref = residual_block_ref(x, params)
    assert out.shape == (N, C, L)
    err = jnp.max(jnp.abs(out - ref))
    # Tolerance reflects bf16 MXU operands (f32 accumulation) in both paths.
    assert jnp.allclose(out, ref, atol=1e-2, rtol=1e-2), f"max abs err {err}"

    print("KERNEL_OK")
</pallas_src>

<mosaic_0001>
module attributes {stable_mosaic.version = 11 : i64} {
  func.func @conv_stats_kernel(%arg0: i32, %arg1: memref<1x64x128xf32, #tpu.memory_space<vmem>>, %arg2: memref<3x64x64xbf16, #tpu.memory_space<vmem>>, %arg3: memref<1x64x128xf32, #tpu.memory_space<vmem>>, %arg4: memref<1x64x1xf32, #tpu.memory_space<vmem>>, %arg5: memref<1x64x1xf32, #tpu.memory_space<vmem>>) attributes {dimension_semantics = [#tpu.dimension_semantics<parallel>], iteration_bounds = array<i64: 2>, scalar_prefetch = 0 : i64, scratch_operands = 0 : i64, tpu.core_type = #tpu.core_type<tc>, window_params = [{transform_indices = @transform_0, window_bounds = array<i64: 1, 64, 128>}, {pipeline_mode = #tpu.pipeline_mode<synchronous>, transform_indices = @transform_1, window_bounds = array<i64: 3, 64, 64>}, {transform_indices = @transform_2, window_bounds = array<i64: 1, 64, 128>}, {transform_indices = @transform_3, window_bounds = array<i64: 1, 64, 1>}, {transform_indices = @transform_4, window_bounds = array<i64: 1, 64, 1>}]} {
    %c0 = arith.constant 0 : index
    %c0_0 = arith.constant 0 : index
    %c0_1 = arith.constant 0 : index
    %0 = vector.load %arg1[%c0, %c0_0, %c0_1] : memref<1x64x128xf32, #tpu.memory_space<vmem>>, vector<1x64x128xf32>
    %1 = vector.shape_cast %0 : vector<1x64x128xf32> to vector<64x128xf32>
    %2 = tpu.iota {dimensions = array<i32: 1>} : vector<1x128xi32>
    %c0_i32 = arith.constant 0 : i32
    %3 = vector.broadcast %c0_i32 : i32 to vector<1x128xi32>
    %4 = arith.cmpi ne, %2, %3 : vector<1x128xi32>
    %c1_i32 = arith.constant 1 : i32
    %5 = tpu.dynamic_rotate %1 by %c1_i32 dim 1 : vector<64x128xf32>, i32 -> vector<64x128xf32>
    %cst = arith.constant 0.000000e+00 : f32
    %6 = vector.shape_cast %4 : vector<1x128xi1> to vector<1x128xi1>
    %7 = vector.broadcast %6 : vector<1x128xi1> to vector<64x128xi1>
    %8 = vector.broadcast %cst : f32 to vector<64x128xf32>
    %9 = arith.select %7, %5, %8 : vector<64x128xi1>, vector<64x128xf32>
    %c127_i32 = arith.constant 127 : i32
    %10 = vector.broadcast %c127_i32 : i32 to vector<1x128xi32>
    %11 = arith.cmpi ne, %2, %10 : vector<1x128xi32>
    %c127_i32_2 = arith.constant 127 : i32
    %12 = tpu.dynamic_rotate %1 by %c127_i32_2 dim 1 : vector<64x128xf32>, i32 -> vector<64x128xf32>
    %cst_3 = arith.constant 0.000000e+00 : f32
    %13 = vector.shape_cast %11 : vector<1x128xi1> to vector<1x128xi1>
    %14 = vector.broadcast %13 : vector<1x128xi1> to vector<64x128xi1>
    %15 = vector.broadcast %cst_3 : f32 to vector<64x128xf32>
    %16 = arith.select %14, %12, %15 : vector<64x128xi1>, vector<64x128xf32>
    %c0_4 = arith.constant 0 : index
    %c0_5 = arith.constant 0 : index
    %c0_6 = arith.constant 0 : index
    %17 = vector.load %arg2[%c0_4, %c0_5, %c0_6] : memref<3x64x64xbf16, #tpu.memory_space<vmem>>, vector<1x64x64xbf16>
    %18 = vector.shape_cast %17 : vector<1x64x64xbf16> to vector<64x64xbf16>
    %19 = arith.truncf %9 : vector<64x128xf32> to vector<64x128xbf16>
    %cst_7 = arith.constant dense<0.000000e+00> : vector<64x128xf32>
    %20 = tpu.matmul %18, %19, %cst_7 {dimension_numbers = #tpu.dot_dimension_numbers<[1], [0], [0], [1], [0, 0, 1, 1], [], []>} : vector<64x64xbf16>, vector<64x128xbf16>, vector<64x128xf32> -> vector<64x128xf32>
    %c1 = arith.constant 1 : index
    %c0_8 = arith.constant 0 : index
    %c0_9 = arith.constant 0 : index
    %21 = vector.load %arg2[%c1, %c0_8, %c0_9] : memref<3x64x64xbf16, #tpu.memory_space<vmem>>, vector<1x64x64xbf16>
    %22 = vector.shape_cast %21 : vector<1x64x64xbf16> to vector<64x64xbf16>
    %23 = arith.truncf %1 : vector<64x128xf32> to vector<64x128xbf16>
    %cst_10 = arith.constant dense<0.000000e+00> : vector<64x128xf32>
    %24 = tpu.matmul %22, %23, %cst_10 {dimension_numbers = #tpu.dot_dimension_numbers<[1], [0], [0], [1], [0, 0, 1, 1], [], []>} : vector<64x64xbf16>, vector<64x128xbf16>, vector<64x128xf32> -> vector<64x128xf32>
    %25 = arith.addf %20, %24 : vector<64x128xf32>
    %c2 = arith.constant 2 : index
    %c0_11 = arith.constant 0 : index
    %c0_12 = arith.constant 0 : index
    %26 = vector.load %arg2[%c2, %c0_11, %c0_12] : memref<3x64x64xbf16, #tpu.memory_space<vmem>>, vector<1x64x64xbf16>
    %27 = vector.shape_cast %26 : vector<1x64x64xbf16> to vector<64x64xbf16>
    %28 = arith.truncf %16 : vector<64x128xf32> to vector<64x128xbf16>
    %cst_13 = arith.constant dense<0.000000e+00> : vector<64x128xf32>
    %29 = tpu.matmul %27, %28, %cst_13 {dimension_numbers = #tpu.dot_dimension_numbers<[1], [0], [0], [1], [0, 0, 1, 1], [], []>} : vector<64x64xbf16>, vector<64x128xbf16>, vector<64x128xf32> -> vector<64x128xf32>
    %30 = arith.addf %25, %29 : vector<64x128xf32>
    %c0_14 = arith.constant 0 : index
    %c0_15 = arith.constant 0 : index
    %c0_16 = arith.constant 0 : index
    %31 = vector.load %arg3[%c0_14, %c0_15, %c0_16] : memref<1x64x128xf32, #tpu.memory_space<vmem>>, vector<1x64x128xf32>
    %32 = vector.shape_cast %31 : vector<1x64x128xf32> to vector<64x128xf32>
    %33 = vector.shape_cast %30 : vector<64x128xf32> to vector<1x64x128xf32>
    tpu.vector_store %arg3[%c0_14, %c0_15, %c0_16], %33 {strides = array<i32>} : memref<1x64x128xf32, #tpu.memory_space<vmem>>, vector<1x64x128xf32>,
    %cst_17 = arith.constant dense<0.000000e+00> : vector<64xf32>
    %34 = vector.multi_reduction <add>, %30, %cst_17 [1] : vector<64x128xf32> to vector<64xf32>
    %35 = vector.shape_cast %34 : vector<64xf32> to vector<64x1xf32>
    %c0_18 = arith.constant 0 : index
    %c0_19 = arith.constant 0 : index
    %c0_20 = arith.constant 0 : index
    %36 = vector.load %arg4[%c0_18, %c0_19, %c0_20] : memref<1x64x1xf32, #tpu.memory_space<vmem>>, vector<1x64x1xf32>
    %37 = vector.shape_cast %36 : vector<1x64x1xf32> to vector<64x1xf32>
    %38 = vector.shape_cast %35 : vector<64x1xf32> to vector<1x64x1xf32>
    tpu.vector_store %arg4[%c0_18, %c0_19, %c0_20], %38 {strides = array<i32>} : memref<1x64x1xf32, #tpu.memory_space<vmem>>, vector<1x64x1xf32>,
    %39 = arith.mulf %30, %30 : vector<64x128xf32>
    %cst_21 = arith.constant dense<0.000000e+00> : vector<64xf32>
    %40 = vector.multi_reduction <add>, %39, %cst_21 [1] : vector<64x128xf32> to vector<64xf32>
    %41 = vector.shape_cast %40 : vector<64xf32> to vector<64x1xf32>
    %c0_22 = arith.constant 0 : index
    %c0_23 = arith.constant 0 : index
    %c0_24 = arith.constant 0 : index
    %42 = vector.load %arg5[%c0_22, %c0_23, %c0_24] : memref<1x64x1xf32, #tpu.memory_space<vmem>>, vector<1x64x1xf32>
    %43 = vector.shape_cast %42 : vector<1x64x1xf32> to vector<64x1xf32>
    %44 = vector.shape_cast %41 : vector<64x1xf32> to vector<1x64x1xf32>
    tpu.vector_store %arg5[%c0_22, %c0_23, %c0_24], %44 {strides = array<i32>} : memref<1x64x1xf32, #tpu.memory_space<vmem>>, vector<1x64x1xf32>,
    return
  }
  func.func @transform_0(%arg0: i32) -> (i32, i32, i32) {
    %c0_i32 = arith.constant 0 : i32
    %c0_i32_0 = arith.constant 0 : i32
    %c0_i32_1 = arith.constant 0 : i32
    return %arg0, %c0_i32, %c0_i32_0 : i32, i32, i32
  }
  func.func @transform_1(%arg0: i32) -> (i32, i32, i32) {
    %c0_i32 = arith.constant 0 : i32
    %c0_i32_0 = arith.constant 0 : i32
    %c0_i32_1 = arith.constant 0 : i32
    %c0_i32_2 = arith.constant 0 : i32
    return %c0_i32, %c0_i32_0, %c0_i32_1 : i32, i32, i32
  }
  func.func @transform_2(%arg0: i32) -> (i32, i32, i32) {
    %c0_i32 = arith.constant 0 : i32
    %c0_i32_0 = arith.constant 0 : i32
    %c0_i32_1 = arith.constant 0 : i32
    return %arg0, %c0_i32, %c0_i32_0 : i32, i32, i32
  }
  func.func @transform_3(%arg0: i32) -> (i32, i32, i32) {
    %c0_i32 = arith.constant 0 : i32
    %c0_i32_0 = arith.constant 0 : i32
    %c0_i32_1 = arith.constant 0 : i32
    return %arg0, %c0_i32, %c0_i32_0 : i32, i32, i32
  }
  func.func @transform_4(%arg0: i32) -> (i32, i32, i32) {
    %c0_i32 = arith.constant 0 : i32
    %c0_i32_0 = arith.constant 0 : i32
    %c0_i32_1 = arith.constant 0 : i32
    return %arg0, %c0_i32, %c0_i32_0 : i32, i32, i32
  }
}

</mosaic_0001>

<bundles_post_ra>
// kernel: tpu_custom_call.1
= control target key start
LH: loop header
LB: loop body
LE: loop exit
PB: predicated region body
PF: predicated region fallthrough
CT: control target
= control target key end

     0   :  { %10 = vsyncpa [#allocation3], 0  ;;  %s1610_s0 = inlined_call_operand.hbm [shape: f32[2,64,128], index: 0, kind: input, shape index: {}]   ;;  %s1611_s1 = inlined_call_operand.hbm [shape: bf16[3,64,64], index: 1, kind: input, shape index: {}]   ;;  %s1612_s2 = inlined_call_operand.hbm [shape: f32[2,64,128], index: 2, kind: output, shape index: {0}]   ;;  %s1613_s3 = inlined_call_operand.vmem [shape: f32[2,64,1], index: 3, kind: output, shape index: {1}]   ;;  %s1614_s4 = inlined_call_operand.vmem [shape: f32[2,64,1], index: 4, kind: output, shape index: {2}]  }
   0x1   :  { %12 = vsyncpa [#allocation3 + $0x1], 0 }
   0x2   :  { %13 = vsyncpa [#allocation6], 0 }
   0x3   :  { %14 = vsyncpa [#allocation4], 0 }
   0x4   :  { %16 = vsyncpa [#allocation4 + $0x1], 0  ;;  %s1316_s15 = smov 0   ;;  %s1318_s16 = smov 0  }
   0x5   :  { %s1320_s17 = smov 0   ;;  %s1322_s18 = smov 0  }
   0x6 LB: > { %s1337_s19 = sadd.s32 4294967295, %s1278_s18   ;;  %s887_s20 = sadd.s32 4294967294, %s1278_s18   ;;  %s1278_s18 = sphi %s1322_s18, %s1640_s18   ;;  %s1274_s17 = sphi %s1320_s17, %s1639_s17   ;;  %s1270_s16 = sphi %s1318_s16, %s1638_s16   ;;  %s1266_s15 = sphi %s1316_s15, %s1637_s15  }
   0x7   : > { %p42_p0 = scmp.ne.s32.totalorder %s1270_s16, %s1266_s15  ;;  %p1615_p1 = scmp.eq.s32.totalorder %s1337_s19, 0 }
   0x8   : > { %p93_p3 = scmp.eq.s32.totalorder %s887_s20, 1  ;;  %p888_p5 = scmp.ge.s32.totalorder %s1278_s18, 1 }
   0x9   : > { %p1346_p4 = por %p1615_p1, %p42_p0  ;;  %p152_p7 = scmp.lt.s32.totalorder %s1278_s18, 3 }
   0xa   : > { %p1351_p6 = por %p93_p3, %p42_p0  ;;  %s1280_s24 = smov [#allocation5]  }
   0xb   : > { %s1619_s21 = scalar_select %p1346_p4, 1, 0 }
   0xc   : > { %s1620_s22 = scalar_select %p1351_p6, 1, 0 }
   0xd   : > { %p1356_p8 = pnand %p888_p5, %p152_p7  ;;  %s164_s25 = sshll.u32 %s1280_s24, 4  ;;  %s165_s25 = int_to_ptr.vmem [resolvable:$true] %s164_s25 }
   0xe   : > { %s1370_s27 = sadd.s32 1, %s1278_s18   ;;  %s29_s28 = sadd.s32 1, %s1274_s17 }
   0xf   : > { %s1621_s23 = scalar_select %p1356_p8, 1, 0 }
  0x10   : > { %p1047_p9 = pneg %p1356_p8  ;;  %s26_s29 = ssub.s32 %s1278_s18, %s1370_s27 }
  0x11   : > { %s1167_s30 = scalar_lea.vmem %s165_s25, 1536  ;;  %p1175_p5 = scmp.lt.s32.totalorder %s165_s25, %s165_s25 }
  0x12   : > { %p1365_p11 = pnand %p1047_p9, %p1615_p1  ;;  %p1168_p13 = scmp.ne.s32.totalorder %s165_s25, %s1167_s30 }
  0x13   : > { %p1176_p7 = scmp.lt.s32.totalorder %s1167_s30, %s1167_s30 }
  0x14   : > { %p1158_p12 = pneg %p1365_p11 }
  0x15   : > { %p1177_p10 = por %p1176_p7, %p1175_p5 }
  0x16   : > { %p1170_p0 = pnand %p1168_p13, %p1158_p12 }
  0x18   : > { %p1171_p3 = pneg %p1170_p0 }
  0x1a   : > { %p1178_p2 = pnand %p1177_p10, %p1171_p3 }
  0x1c   : > { %1181 = shalt.err (!%p1178_p2)
}
  0x1d   : > { %s1281_s5 = smov 64   ;;  %s1282_s6 = smov 4  }
  0x1e   : > { %1050 = dma.hbm_to_vmem [thread:$0]  (!%p1365_p11), %s1611_s1, 1536, %s165_s25, [#allocation6], %s1281_s5, %s1281_s5, %s1282_s6  }
  0x1f   : > { %p27_p9 = scmp.eq.s32.totalorder %s26_s29, 0  ;;  %p36_p12 = scmp.ne.s32.totalorder %s1274_s17, %s1270_s16 }
  0x20   : > { %p37_p10 = scmp.eq.s32.totalorder %s1278_s18, 0  ;;  %p1060_p2 = scmp.lt.s32.totalorder %s1278_s18, 2 }
  0x21   : > { %s1387_s9 = scalar_select %p27_p9, %s1274_s17, %s29_s28  }
  0x22   : > { %p38_p13 = por %p37_p10, %p36_p12  ;;  %p1623_p0 = scmp.eq.s32.totalorder %s1337_s19, 1 }
  0x23   : > { %s178_s11 = sand.u32 1, %s1274_s17   ;;  %s955_s12 = sshll.u32 %s1278_s18, 10 }
  0x24   : > { %p1391_p3 = por %p1623_p0, %p36_p12  ;;  %s891_s13 = sshll.u32 %s178_s11, 6 }
  0x25   : > { %s1400_s24 = scalar_lea.hbm %s1610_s0, %s955_s12  ;;  %s182_s25 = scalar_lea.vmem [#allocation2], %s891_s13 }
  0x26   : > { %s1624_s10 = scalar_select %p1391_p3, 1, 0 }
  0x27   : > { %s189_s26 = sshll.u32 %s182_s25, 4  ;;  %p1402_p11 = pnand %p1060_p2, %p38_p13  ;;  %s1406_s26 = int_to_ptr.vmem [resolvable:$true] %s189_s26 }
  0x28   : > { %s1408_s29 = scalar_lea.sflag [#allocation3], %s178_s11  ;;  %s1182_s30 = scalar_lea.hbm %s1400_s24, 1024 }
  0x29   : > { %p1183_p5 = scmp.ne.s32.totalorder %s1400_s24, %s1182_s30  ;;  %p1184_p7 = pneg %p1402_p11 }
  0x2a   : > { %s1187_s7 = scalar_lea.hbm %s1610_s0, 2048  ;;  %p1188_p10 = scmp.lt.s32.totalorder %s1400_s24, %s1610_s0 }
  0x2b   : > { %p1185_p9 = pnand %p1184_p7, %p1183_p5  ;;  %p1189_p2 = scmp.lt.s32.totalorder %s1187_s7, %s1182_s30 }
  0x2d   : > { %p1186_p12 = pneg %p1185_p9  ;;  %p1190_p13 = por %p1189_p2, %p1188_p10 }
  0x2f   : > { %p1191_p0 = pnand %p1190_p13, %p1186_p12 }
  0x31   : > { %1194 = shalt.err (!%p1191_p0)
}
  0x32   : > { %s1195_s11 = scalar_lea.vmem %s1406_s26, 1024  ;;  %s1283_s13 = smov [#allocation2]  }
  0x33   : > { %p1196_p1 = scmp.ne.s32.totalorder %s1406_s26, %s1195_s11  ;;  %s1200_s14 = sshll.u32 %s1283_s13, 4  ;;  %s1201_s14 = int_to_ptr.vmem [resolvable:$false] %s1200_s14 }
  0x34   : > { %s1202_s20 = scalar_lea.vmem %s1201_s14, 2048  ;;  %p1203_p9 = scmp.lt.s32.totalorder %s1406_s26, %s1201_s14 }
  0x35   : > { %p1198_p6 = pnand %p1196_p1, %p1184_p7  ;;  %p1204_p3 = scmp.lt.s32.totalorder %s1202_s20, %s1195_s11 }
  0x37   : > { %p1199_p5 = pneg %p1198_p6  ;;  %p1205_p4 = por %p1204_p3, %p1203_p9 }
  0x39   : > { %p1206_p8 = pnand %p1205_p4, %p1199_p5 }
  0x3b   : > { %1209 = shalt.err (!%p1206_p8)
}
  0x3c   : > { %s1284_s25 = smov 128   ;;  %s1285_s30 = smov 8  }
  0x3d   : > { %1054 = dma.hbm_to_vmem [thread:$0]  (!%p1402_p11), %s1400_s24, 1024, %s1406_s26, %s1408_s29, %s1284_s25, %s1284_s25, %s1285_s30  }
  0x3e   : > { %p1626_p1 = scmp.ne.s32.totalorder %s1621_s23, 0 }
  0x3f   : > { %s1432_s5 = sand.u32 (!%p1626_p1), 1, %s1270_s16   ;;  %p1627_p4 = scmp.ne.s32.totalorder (!%p1626_p1), %s1619_s21, 0 }
  0x40   : > { %201 = sbr.rel (%p1626_p1) target bundleno = 585 (0x249), region = 28  ;;  %s895_s6 = sshll.u32 (!%p1626_p1), %s1432_s5, 6 }
  0x41   : > { %s204_s7 = scalar_lea.sflag (!%p1626_p1), [#allocation3], %s1432_s5  ;;  %s207_s8 = scalar_lea.vmem (!%p1626_p1), [#allocation2], %s895_s6 }
  0x45   : > { %1253 = dma.done.wait (%p1627_p4), %s204_s7, 1024  }
  0x46   : > { %1255 = vsyncadd (%p1627_p4), %s204_s7, 4294966272  ;;  %p1628_p6 = scmp.eq.s32.totalorder %s1337_s19, 0 }
  0x48   : > { %1257 = dma.done.wait (%p1628_p6), [#allocation6], 1536   ;;  %p1629_p8 = pmov %p1628_p6 }
  0x49   : > { %v263_v0 = vld [vmem:[%s207_s8 + $0x30] sm:$0xff]  ;;  %v264_v1 = vld [vmem:[%s207_s8 + $0x38] sm:$0xff]  ;;  %v261_v2 = vld [vmem:[%s207_s8 + $0x20] sm:$0xff]  ;;  %vm366_vm0 = vcmask 523264   ;;  %s1286_s21 = smov 1   ;;  %s1287_s23 = smov 127   ;;  %v265_v22 = vlaneseq }
  0x4a   : > { %1259 = vsyncadd (%p1629_p8), [#allocation6], 4294965760  ;;  %v1104_v3 = vpack.i.bf16 %v264_v1, %v263_v0  ;;  %v262_v4 = vld [vmem:[%s207_s8 + $0x28] sm:$0xff]  ;;  %v259_v5 = vld [vmem:[%s207_s8 + $0x10] sm:$0xff]  ;;  %v345_v7 = vpack.c.bf16 %v264_v1, %v263_v0  ;;  %s1516_s24 = scalar_lea.vmem [#allocation7], %s895_s6  ;;  %s958_s28 = sshll.u32 %s1337_s19, 10 }
  0x4b   : > { %v260_v6 = vld [vmem:[%s207_s8 + $0x18] sm:$0xff]  ;;  %v257_v9 = vld [vmem:[%s207_s8] sm:$0xff]  ;;  %v258_v10 = vld [vmem:[%s207_s8 + $0x8] sm:$0xff]  ;;  %v1109_v11 = vpack.i.bf16 %v262_v4, %v261_v2  ;;  %v344_v12 = vpack.c.bf16 %v262_v4, %v261_v2  ;;  %v266_v23 = vand.u32 127, %v265_v22  ;;  %s748_s26 = sshll.u32 %s1516_s24, 4  ;;  %s1533_s11 = scalar_lea.hbm %s1612_s2, %s958_s28  ;;  %s1527_s26 = int_to_ptr.vmem [resolvable:$true] %s748_s26 }
  0x4c   : > { %v1114_v8 = vpack.i.bf16 %v260_v6, %v259_v5  ;;  %1105 = vrot.lane.b32.xlu0 %v1104_v3, %s1286_s21  ;;  %983 = vmatprep.subr.bf16.mxu0 %v345_v7  ;;  %v1144_v13 = vld [vmem:[#allocation5 + $0x20] sm:$0xff]   ;;  %v1119_v14 = vpack.i.bf16 %v258_v10, %v257_v9  ;;  %v343_v15 = vpack.c.bf16 %v260_v6, %v259_v5  ;;  %v1145_v18 = vld [vmem:[#allocation5 + $0x28] sm:$0xff]   ;;  %v1146_v19 = vld [vmem:[#allocation5 + $0x30] sm:$0xff]   ;;  %s725_s13 = scalar_lea.sflag [#allocation4], %s1432_s5  ;;  %s1210_s14 = scalar_lea.vmem %s1527_s26, 1024 }
  0x4d   : > { %984 = vmatpush3.bf16.msra.mxu0 %v345_v7  ;;  %991 = vmatprep.mubr.msk.bf16.mxu0 %vm366_vm0, %v1144_v13  ;;  %v1148_v16 = vld [vmem:[#allocation5] sm:$0xff]   ;;  %v342_v17 = vpack.c.bf16 %v258_v10, %v257_v9  ;;  %v1147_v20 = vld [vmem:[#allocation5 + $0x38] sm:$0xff]   ;;  %vm267_vm1 = vcmp.ne.s32.totalorder %v266_v23, 0  ;;  %vm294_vm3 = vcmp.ne.s32.totalorder %v266_v23, 127  ;;  %v1149_v57 = vld [vmem:[#allocation5 + $0x8] sm:$0xff]   ;;  %p1211_p3 = scmp.ne.s32.totalorder %s1527_s26, %s1210_s14  ;;  %p1634_p11 = scmp.ne.s32.totalorder %s1624_s10, 0 }
  0x4e   : > { %1115 = vrot.lane.b32.xlu1 %v1114_v8, %s1286_s21  ;;  %985 = vmatprep.subr.bf16.mxu0 %v344_v12  ;;  %v1151_v21 = vld [vmem:[#allocation5 + $0x40] sm:$0xff]   ;;  %vm1452_vm2 = vmpackc.low %vm267_vm1, %vm267_vm1  ;;  %v1150_v59 = vld [vmem:[#allocation5 + $0x10] sm:$0xff]   ;;  %s1288_s20 = smov [#allocation7]  }
  0x4f   : > { %1007 = vmatprep.mubr.msk.bf16.mxu1 %vm366_vm0, %v1148_v16  ;;  %vm1462_vm4 = vmpackc.low %vm294_vm3, %vm294_vm3  ;;  %v1152_v60 = vld [vmem:[#allocation5 + $0x18] sm:$0xff]   ;;  %v1153_v61 = vld [vmem:[#allocation5 + $0x48] sm:$0xff]   ;;  %p1212_p7 = pnand %p1211_p3, %p1634_p11  ;;  %s1214_s25 = sshll.u32 %s1288_s20, 4  ;;  %s1215_s25 = int_to_ptr.vmem [resolvable:$false] %s1214_s25 }
  0x50   : > { %1110 = vrot.lane.b32.xlu0 %v1109_v11, %s1286_s21  ;;  %v1154_v62 = vld [vmem:[#allocation5 + $0x50] sm:$0xff]   ;;  %v1155_v63 = vld [vmem:[#allocation5 + $0x58] sm:$0xff]   ;;  %s1216_s30 = scalar_lea.vmem %s1215_s25, 2048  ;;  %p1217_p10 = scmp.lt.s32.totalorder %s1527_s26, %s1215_s25 }
  0x51   : > { %986 = vmatpush3.bf16.msra.mxu0 %v344_v12  ;;  %p1213_p12 = pneg %p1212_p7  ;;  %p1218_p2 = scmp.lt.s32.totalorder %s1216_s30, %s1210_s14 }
  0x52   : > { %1120 = vrot.lane.b32.xlu1 %v1119_v14, %s1286_s21  ;;  %987 = vmatprep.subr.bf16.mxu0 %v343_v15 }
  0x53   : > { %p1219_p13 = por %p1218_p2, %p1217_p10 }
  0x54   : > { %1125 = vrot.lane.b32.xlu0 %v1104_v3, %s1287_s23 }
  0x55   : > { %988 = vmatpush3.bf16.msra.mxu0 %v343_v15  ;;  %p1220_p0 = pnand %p1219_p13, %p1213_p12 }
  0x56   : > { %1130 = vrot.lane.b32.xlu1 %v1109_v11, %s1287_s23  ;;  %989 = vmatprep.subr.bf16.mxu0 %v342_v17 }
  0x58   : > { %1135 = vrot.lane.b32.xlu0 %v1114_v8, %s1287_s23 }
  0x59   : > { %990 = vmatpush3.bf16.msra.mxu0 %v342_v17 }
  0x5a   : > { %1140 = vrot.lane.b32.xlu1 %v1119_v14, %s1287_s23 }
  0x5c   : > { %992 = vmatmul.mubr.msk.bf16.vlgmr.msra.gmra.mxu0 %vm366_vm0, %v1145_v18 }
  0x5d   : > { %995 = vmatprep.mubr.msk.bf16.mxu0 %vm366_vm0, %v1146_v19 }
  0x64   : > { %996 = vmatmul.mubr.msk.bf16.gmra.mxu0 %vm366_vm0, %v1147_v20 }
  0x65   : > { %1023 = vmatprep.mubr.msk.bf16.mxu0 %vm366_vm0, %v1151_v21 }
  0xbe   : > { %v1106_v24 = vpop.permute.xlu0 %1105 }
  0xbf   : > { %v1108_v25 = vunpack.i.h.bf16 %v1106_v24  ;;  %v1107_v26 = vunpack.i.l.bf16 %v1106_v24 }
  0xc0   : > { %v1116_v27 = vpop.permute.xlu1 %1115 }
  0xc1   : > { %v915_v29 = vpack.c.bf16 %v1108_v25, %v1107_v26  ;;  %v1118_v31 = vunpack.i.h.bf16 %v1116_v27  ;;  %v1117_v32 = vunpack.i.l.bf16 %v1116_v27 }
  0xc2   : > { %v1111_v30 = vpop.permute.xlu0 %1110 }
  0xc3   : > { %v1113_v33 = vunpack.i.h.bf16 %v1111_v30  ;;  %v1112_v34 = vunpack.i.l.bf16 %v1111_v30  ;;  %999 = vmatprep.subr.msk.bf16.mxu1 %vm1452_vm2, %v915_v29  ;;  %v921_v37 = vpack.c.bf16 %v1118_v31, %v1117_v32 }
  0xc4   : > { %v1121_v35 = vpop.permute.xlu1 %1120  ;;  %1000 = vmatpush3.bf16.msk.msra.mxu1 %vm1452_vm2, %v915_v29 }
  0xc5   : > { %v918_v36 = vpack.c.bf16 %v1113_v33, %v1112_v34  ;;  %v1123_v41 = vunpack.i.h.bf16 %v1121_v35  ;;  %v1122_v42 = vunpack.i.l.bf16 %v1121_v35 }
  0xc6   : > { %v1126_v38 = vpop.permute.xlu0 %1125 }
  0xc7   : > { %v1128_v39 = vunpack.i.h.bf16 %v1126_v38  ;;  %v1127_v40 = vunpack.i.l.bf16 %v1126_v38  ;;  %1001 = vmatprep.subr.msk.bf16.mxu1 %vm1452_vm2, %v918_v36  ;;  %v924_v50 = vpack.c.bf16 %v1123_v41, %v1122_v42 }
  0xc8   : > { %v1131_v43 = vpop.permute.xlu1 %1130  ;;  %1002 = vmatpush3.bf16.msk.msra.mxu1 %vm1452_vm2, %v918_v36 }
  0xc9   : > { %v1133_v45 = vunpack.i.h.bf16 %v1131_v43  ;;  %v1132_v46 = vunpack.i.l.bf16 %v1131_v43  ;;  %v935_v47 = vpack.c.bf16 %v1128_v39, %v1127_v40  ;;  %1003 = vmatprep.subr.msk.bf16.mxu1 %vm1452_vm2, %v921_v37 }
  0xca   : > { %v1136_v49 = vpop.permute.xlu0 %1135 }
  0xcb   : > { %v938_v48 = vpack.c.bf16 %v1133_v45, %v1132_v46  ;;  %1015 = vmatprep.subr.msk.bf16.mxu0 %vm1462_vm4, %v935_v47  ;;  %v1138_v51 = vunpack.i.h.bf16 %v1136_v49  ;;  %v1137_v52 = vunpack.i.l.bf16 %v1136_v49 }
  0xcc   : > { %v1141_v53 = vpop.permute.xlu1 %1140  ;;  %1004 = vmatpush3.bf16.msk.msra.mxu1 %vm1452_vm2, %v921_v37  ;;  %1016 = vmatpush3.bf16.msk.msra.mxu0 %vm1462_vm4, %v935_v47 }
  0xcd   : > { %1005 = vmatprep.subr.msk.bf16.mxu1 %vm1452_vm2, %v924_v50  ;;  %v941_v54 = vpack.c.bf16 %v1138_v51, %v1137_v52  ;;  %1017 = vmatprep.subr.msk.bf16.mxu0 %vm1462_vm4, %v938_v48  ;;  %v1143_v55 = vunpack.i.h.bf16 %v1141_v53  ;;  %v1142_v56 = vunpack.i.l.bf16 %v1141_v53 }
  0xcf   : > { %v944_v58 = vpack.c.bf16 %v1143_v55, %v1142_v56 }
  0xd0   : > { %1006 = vmatpush3.bf16.msk.msra.mxu1 %vm1452_vm2, %v924_v50  ;;  %1018 = vmatpush3.bf16.msk.msra.mxu0 %vm1462_vm4, %v938_v48 }
  0xd1   : > { %1031 = vmatprep.subr.msk.bf16.mxu1 %vm1462_vm4, %v935_v47  ;;  %1019 = vmatprep.subr.msk.bf16.mxu0 %vm1462_vm4, %v941_v54 }
  0xd3   : > { %1008 = vmatmul.mubr.msk.bf16.vlgmr.msra.gmra.mxu1 %vm366_vm0, %v1149_v57 }
  0xd4   : > { %1035 = vmatpush3.bf16.msk.msra.mxu1 %vm1462_vm4, %v935_v47  ;;  %1020 = vmatpush3.bf16.msk.msra.mxu0 %vm1462_vm4, %v941_v54 }
  0xd5   : > { %1032 = vmatprep.subr.msk.bf16.mxu1 %vm1462_vm4, %v938_v48  ;;  %1021 = vmatprep.subr.msk.bf16.mxu0 %vm1462_vm4, %v944_v58 }
  0xd6   : > { %1011 = vmatprep.mubr.msk.bf16.mxu1 %vm366_vm0, %v1150_v59 }
  0xd8   : > { %1036 = vmatpush3.bf16.msk.msra.mxu1 %vm1462_vm4, %v938_v48  ;;  %1022 = vmatpush3.bf16.msk.msra.mxu0 %vm1462_vm4, %v944_v58 }
  0xd9   : > { %1033 = vmatprep.subr.msk.bf16.mxu1 %vm1462_vm4, %v941_v54 }
  0xdb   : > { %1012 = vmatmul.mubr.msk.bf16.gmra.mxu1 %vm366_vm0, %v1152_v60  ;;  %1024 = vmatmul.mubr.msk.bf16.vlgmr.msra.gmra.mxu0 %vm366_vm0, %v1153_v61 }
  0xdc   : > { %1037 = vmatpush3.bf16.msk.msra.mxu1 %vm1462_vm4, %v941_v54  ;;  %1027 = vmatprep.mubr.msk.bf16.mxu1 %vm366_vm0, %v1154_v62 }
  0xdd   : > { %1034 = vmatprep.subr.msk.bf16.mxu1 %vm1462_vm4, %v944_v58 }
  0xe0   : > { %1038 = vmatpush3.bf16.msk.msra.mxu1 %vm1462_vm4, %v944_v58 }
  0xe3   : > { %1028 = vmatmul.mubr.msk.bf16.vlgmr.msra.gmra.mxu1 %vm366_vm0, %v1155_v63 }
 0x11c   : > { %v993_v0 = vpop.f32.mrf.mxu0 }
 0x11e   : > { %v413_v1 = vpop.f32.mrf.mxu0 }
 0x120   : > { %v994_v2 = vpop.f32.mrf.mxu0 }
 0x122   : > { %v416_v3 = vpop.f32.mrf.mxu0 }
 0x124   : > { %v997_v4 = vpop.f32.mrf.mxu0 }
 0x126   : > { %v429_v5 = vpop.f32.mrf.mxu0 }
 0x128   : > { %v998_v7 = vpop.f32.mrf.mxu0 }
 0x12a   : > { %v432_v10 = vpop.f32.mrf.mxu0 }
 0x193   : > { %v1009_v6 = vpop.f32.mrf.mxu1 }
 0x194   : > { %v519_v12 = vadd.f32 %v1009_v6, %v993_v0 }
 0x195   : > { %v510_v8 = vpop.f32.mrf.mxu1 }
 0x196   : > { %v511_v15 = vadd.f32 %v510_v8, %v413_v1 }
 0x197   : > { %v1010_v9 = vpop.f32.mrf.mxu1 }
 0x198   : > { %v522_v19 = vadd.f32 %v1010_v9, %v994_v2 }
 0x199   : > { %v513_v11 = vpop.f32.mrf.mxu1 }
 0x19a   : > { %v514_v24 = vadd.f32 %v513_v11, %v416_v3 }
 0x19b   : > { %v1013_v13 = vpop.f32.mrf.mxu1  ;;  %v1025_v14 = vpop.f32.mrf.mxu0 }
 0x19c   : > { %v653_v16 = vadd.f32 %v1025_v14, %v519_v12  ;;  %v535_v28 = vadd.f32 %v1013_v13, %v997_v4 }
 0x19d   : > { %v526_v17 = vpop.f32.mrf.mxu1  ;;  %v620_v18 = vpop.f32.mrf.mxu0 }
 0x19e   : > { %661 = vst [vmem:[%s1516_s24 + $0x10] sm:$0xff] %v653_v16  ;;  %v651_v20 = vadd.f32 %v620_v18, %v511_v15  ;;  %671 = vadd.xlane.f32.xlu0 %v653_v16  ;;  %v694_v21 = vmul.f32 %v653_v16, %v653_v16  ;;  %v527_v32 = vadd.f32 %v526_v17, %v429_v5 }
 0x19f   : > { %v1014_v22 = vpop.f32.mrf.mxu1  ;;  %v1026_v23 = vpop.f32.mrf.mxu0 }
 0x1a0   : > { %659 = vst [vmem:[%s1516_s24] sm:$0xff] %v651_v20  ;;  %v654_v25 = vadd.f32 %v1026_v23, %v522_v19  ;;  %704 = vadd.xlane.f32.xlu1 %v694_v21  ;;  %v692_v30 = vmul.f32 %v651_v20, %v651_v20  ;;  %v538_v35 = vadd.f32 %v1014_v22, %v998_v7 }
 0x1a1   : > { %v529_v26 = vpop.f32.mrf.mxu1  ;;  %v623_v27 = vpop.f32.mrf.mxu0 }
 0x1a2   : > { %662 = vst [vmem:[%s1516_s24 + $0x18] sm:$0xff] %v654_v25  ;;  %v652_v29 = vadd.f32 %v623_v27, %v514_v24  ;;  %667 = vadd.xlane.f32.xlu0 %v651_v20  ;;  %v530_v38 = vadd.f32 %v529_v26, %v432_v10  ;;  %v695_v40 = vmul.f32 %v654_v25, %v654_v25 }
 0x1a3   : > { %v1029_v31 = vpop.f32.mrf.mxu1 }
 0x1a4   : > { %660 = vst [vmem:[%s1516_s24 + $0x8] sm:$0xff] %v652_v29  ;;  %v657_v33 = vadd.f32 %v1029_v31, %v535_v28  ;;  %700 = vadd.xlane.f32.xlu1 %v692_v30  ;;  %v693_v43 = vmul.f32 %v652_v29, %v652_v29 }
 0x1a5   : > { %v636_v34 = vpop.f32.mrf.mxu1 }
 0x1a6   : > { %665 = vst [vmem:[%s1516_s24 + $0x30] sm:$0xff] %v657_v33  ;;  %v655_v36 = vadd.f32 %v636_v34, %v527_v32  ;;  %673 = vadd.xlane.f32.xlu0 %v654_v25  ;;  %v698_v45 = vmul.f32 %v657_v33, %v657_v33 }
 0x1a7   : > { %v1030_v37 = vpop.f32.mrf.mxu1 }
 0x1a8   : > { %663 = vst [vmem:[%s1516_s24 + $0x20] sm:$0xff] %v655_v36  ;;  %v658_v39 = vadd.f32 %v1030_v37, %v538_v35  ;;  %669 = vadd.xlane.f32.xlu1 %v652_v29  ;;  %v696_v44 = vmul.f32 %v655_v36, %v655_v36 }
 0x1a9   : > { %v639_v41 = vpop.f32.mrf.mxu1 }
 0x1aa   : > { %666 = vst [vmem:[%s1516_s24 + $0x38] sm:$0xff] %v658_v39  ;;  %v656_v42 = vadd.f32 %v639_v41, %v530_v38  ;;  %706 = vadd.xlane.f32.xlu0 %v695_v40  ;;  %v699_v47 = vmul.f32 %v658_v39, %v658_v39 }
 0x1ac   : > { %664 = vst [vmem:[%s1516_s24 + $0x28] sm:$0xff] %v656_v42  ;;  %679 = vadd.xlane.f32.xlu1 %v657_v33  ;;  %v697_v46 = vmul.f32 %v656_v42, %v656_v42 }
 0x1ae   : > { %702 = vadd.xlane.f32.xlu0 %v693_v43 }
 0x1b0   : > { %675 = vadd.xlane.f32.xlu1 %v655_v36 }
 0x1b2   : > { %681 = vadd.xlane.f32.xlu0 %v658_v39 }
 0x1b4   : > { %708 = vadd.xlane.f32.xlu1 %v696_v44 }
 0x1b6   : > { %677 = vadd.xlane.f32.xlu0 %v656_v42 }
 0x1b8   : > { %712 = vadd.xlane.f32.xlu1 %v698_v45 }
 0x1ba   : > { %710 = vadd.xlane.f32.xlu0 %v697_v46 }
 0x1be   : > { %714 = vadd.xlane.f32.xlu0 %v699_v47 }
 0x1bf   : > { %1223 = shalt.err (!%p1220_p0)
}
 0x1c0   : > { %s1224_s6 = scalar_lea.hbm %s1533_s11, 1024  ;;  %s1228_s21 = scalar_lea.hbm %s1612_s2, 2048 }
 0x1c1   : > { %p1225_p5 = scmp.ne.s32.totalorder %s1533_s11, %s1224_s6  ;;  %p1229_p4 = scmp.lt.s32.totalorder %s1533_s11, %s1612_s2 }
 0x1c2   : > { %p1230_p6 = scmp.lt.s32.totalorder %s1228_s21, %s1224_s6 }
 0x1c3   : > { %p1226_p9 = pnand %p1225_p5, %p1634_p11 }
 0x1c4   : > { %p1231_p8 = por %p1230_p6, %p1229_p4 }
 0x1c5   : > { %p1227_p1 = pneg %p1226_p9 }
 0x1c7   : > { %p1232_p3 = pnand %p1231_p8, %p1227_p1 }
 0x1c9   : > { %1235 = shalt.err (!%p1232_p3)
}
 0x1ca   : > { %s1289_s28 = smov 128   ;;  %s1290_s29 = smov 8   ;;  %vm683_vm5 = vcmask 7168  }
 0x1cb   : > { %1045 = dma.vmem_to_hbm [thread:$0]  (%p1634_p11), %s1527_s26, 1024, %s1533_s11, %s725_s13, %s1289_s28, %s1289_s28, %s1290_s29  }
 0x1cc   : > { %p246_p7 = scmp.lt.s32.totalorder %s1337_s19, 1 }
 0x1ce   : > { %s1642_s19 = smov (!%p246_p7, %s1337_s19), 1 }
 0x1cf   : > { %s956_s12 = sshll.u32 %s1642_s19, 6 }
 0x1d0   : > { %s250_s25 = scalar_lea.vmem %s1613_s3, %s956_s12  ;;  %s1566_s7 = scalar_lea.vmem %s1614_s4, %s956_s12 }
 0x227   : > { %v672_v48 = vpop.xlane.xlu0 %671 }
 0x228   : > { %686 = vst.msk [vmem:[%s250_s25 + $0x10] sm:$0xff] %vm683_vm5, %v672_v48 }
 0x229   : > { %v705_v49 = vpop.xlane.xlu1 %704 }
 0x22a   : > { %718 = vst.msk [vmem:[%s1566_s7 + $0x10] sm:$0xff] %vm683_vm5, %v705_v49 }
 0x22b   : > { %v668_v50 = vpop.xlane.xlu0 %667 }
 0x22c   : > { %684 = vst.msk [vmem:[%s250_s25] sm:$0xff] %vm683_vm5, %v668_v50 }
 0x22d   : > { %v701_v51 = vpop.xlane.xlu1 %700 }
 0x22e   : > { %716 = vst.msk [vmem:[%s1566_s7] sm:$0xff] %vm683_vm5, %v701_v51 }
 0x22f   : > { %v674_v52 = vpop.xlane.xlu0 %673 }
 0x230   : > { %687 = vst.msk [vmem:[%s250_s25 + $0x18] sm:$0xff] %vm683_vm5, %v674_v52 }
 0x231   : > { %v670_v53 = vpop.xlane.xlu1 %669 }
 0x232   : > { %685 = vst.msk [vmem:[%s250_s25 + $0x8] sm:$0xff] %vm683_vm5, %v670_v53 }
 0x233   : > { %v707_v54 = vpop.xlane.xlu0 %706 }
 0x234   : > { %719 = vst.msk [vmem:[%s1566_s7 + $0x18] sm:$0xff] %vm683_vm5, %v707_v54 }
 0x235   : > { %v680_v55 = vpop.xlane.xlu1 %679 }
 0x236   : > { %690 = vst.msk [vmem:[%s250_s25 + $0x30] sm:$0xff] %vm683_vm5, %v680_v55 }
 0x237   : > { %v703_v56 = vpop.xlane.xlu0 %702 }
 0x238   : > { %717 = vst.msk [vmem:[%s1566_s7 + $0x8] sm:$0xff] %vm683_vm5, %v703_v56 }
 0x239   : > { %v676_v57 = vpop.xlane.xlu1 %675 }
 0x23a   : > { %688 = vst.msk [vmem:[%s250_s25 + $0x20] sm:$0xff] %vm683_vm5, %v676_v57 }
 0x23b   : > { %v682_v58 = vpop.xlane.xlu0 %681 }
 0x23c   : > { %691 = vst.msk [vmem:[%s250_s25 + $0x38] sm:$0xff] %vm683_vm5, %v682_v58 }
 0x23d   : > { %v709_v59 = vpop.xlane.xlu1 %708 }
 0x23e   : > { %720 = vst.msk [vmem:[%s1566_s7 + $0x20] sm:$0xff] %vm683_vm5, %v709_v59 }
 0x23f   : > { %v678_v60 = vpop.xlane.xlu0 %677 }
 0x240   : > { %689 = vst.msk [vmem:[%s250_s25 + $0x28] sm:$0xff] %vm683_vm5, %v678_v60 }
 0x241   : > { %v713_v61 = vpop.xlane.xlu1 %712 }
 0x242   : > { %722 = vst.msk [vmem:[%s1566_s7 + $0x30] sm:$0xff] %vm683_vm5, %v713_v61 }
 0x243   : > { %v711_v62 = vpop.xlane.xlu0 %710 }
 0x244   : > { %721 = vst.msk [vmem:[%s1566_s7 + $0x28] sm:$0xff] %vm683_vm5, %v711_v62 }
 0x247   : > { %v715_v63 = vpop.xlane.xlu0 %714 }
 0x248   : > { %723 = vst.msk [vmem:[%s1566_s7 + $0x38] sm:$0xff] %vm683_vm5, %v715_v63 }
 0x249 PF: > { %s769_s19 = sand.u32 1, %s1266_s15   ;;  %p1635_p11 = scmp.ne.s32.totalorder %s1620_s22, 0 }
 0x24a   : > { %p1636_p12 = scmp.ge.s32.totalorder %s1278_s18, 2  ;;  %s770_s10 = scalar_lea.sflag [#allocation4], %s769_s19 }
 0x24c   : > { %p1056_p10 = pnand %p1636_p12, %p1635_p11 }
 0x24e   : > { %p1057_p2 = pneg %p1056_p10 }
 0x250   : > { %1261 = dma.done.wait (%p1057_p2), %s770_s10, 1024  }
 0x251   : > { %1263 = vsyncadd (%p1057_p2), %s770_s10, 4294966272  ;;  %p19_p13 = scmp.ge.s32.totalorder %s1370_s27, 4   ;;  %s1637_s15 = smov %s1270_s16 }
 0x252   : > { %s1638_s16 = smov %s1274_s17  ;;  %s1639_s17 = smov %s1387_s9 }
 0x253   : > { %s1640_s18 = smov %s1370_s27  ;;  %21 = sbr.rel (!%p19_p13) target bundleno = 6 (0x6), region = 103 }
 0x258   :  { %791 = vsyncpa [#allocation3], 1 }
 0x259   :  { %793 = vsyncpa [#allocation3 + $0x1], 1 }
 0x25a   :  { %794 = vsyncpa [#allocation6], 1 }
 0x25b   :  { %795 = vsyncpa [#allocation4], 1 }
 0x25c   :  { %797 = vsyncpa [#allocation4 + $0x1], 1 }

</bundles_post_ra>
